<compile_context>
chip_gen: v7x
topology: tpu7x:2x2x1
jax: 0.10.0
libtpu: 0.0.40
codegen_flags: <defaults>
</compile_context>

<pallas_src>
import functools

import numpy as np
import jax
import jax.numpy as jnp
from jax import lax
from jax.experimental import pallas as pl
from jax.experimental.pallas import tpu as pltpu
from scipy.optimize import linear_sum_assignment

INF = 1000000000.0


def _vmem_limit_bytes():
    """Generation-aware scoped-VMEM budget (<=48 MiB on v7x, ~96 MiB otherwise)."""
    try:
        cap = int(pltpu.get_tpu_info().vmem_capacity_bytes)
    except Exception:
        cap = 64 * 1024 * 1024
    return int(min(cap * 3 // 4, 96 * 1024 * 1024))


VMEM_LIMIT = _vmem_limit_bytes()


# ---------------------------------------------------------------------------
# tiling helpers
# ---------------------------------------------------------------------------
def _round_up(x, m):
    return ((x + m - 1) // m) * m


def _lane_tiling(hw, cap):
    """Lane (last-dim) tile + padded extent: full block if it fits, else 128-mult."""
    if hw <= cap:
        return hw, hw
    tile = max((cap // 128) * 128, 128)
    return tile, _round_up(hw, tile)


def _row_tile(n_rows, target):
    if n_rows >= target:
        tile = target
    else:
        tile = _round_up(max(n_rows, 1), 8)
    return tile, _round_up(n_rows, tile)


def _lane_pack(vec, target_tile=1024, pad_value=0.0):
    """Flatten a 1-D vector into a lane-dense [R, 128] slab (R % tile == 0)."""
    n = vec.shape[0]
    r = -(-n // 128)
    tile, r_pad = _row_tile(r, target_tile)
    total = r_pad * 128
    v = jnp.pad(jnp.asarray(vec, jnp.float32), (0, total - n),
                constant_values=pad_value)
    return v.reshape(r_pad, 128), tile


def _xy_from_cols(col_i32, row_i32, width):
    """In-kernel location generation: x = col % w, y = col // w (exact float math)."""
    colf = col_i32.astype(jnp.float32)
    y = jnp.floor(colf / float(width))
    x = colf - y * float(width)
    return jnp.where((row_i32 % 2) == 0, x, y)


# ---------------------------------------------------------------------------
# Pallas kernels
# ---------------------------------------------------------------------------
def _dense_point_loss_kernel(lra_ref, tps_ref, ut_ref, w_ref, out_ref,
                             acc_wl, acc_w, *, width, tile):
    # one MXU matmul per tile:  d = U_t^T @ (tps - lra)   -> [P, tile]
    j = pl.program_id(1)

    @pl.when(j == 0)
    def _():
        acc_wl[...] = jnp.zeros_like(acc_wl)
        acc_w[...] = jnp.zeros_like(acc_w)

    diff = tps_ref[0] - lra_ref[0]                                       # [C, tile]
    d = jnp.dot(ut_ref[...], diff, preferred_element_type=jnp.float32)   # [P, tile]
    p_dim = d.shape[0]
    col = j * tile + lax.broadcasted_iota(jnp.int32, (p_dim, tile), 1)
    row = lax.broadcasted_iota(jnp.int32, (p_dim, tile), 0)
    d = d - _xy_from_cols(col, row, width)
    ad = jnp.abs(d)
    sl1 = jnp.where(ad < 1.0, 0.5 * d * d, ad - 0.5)
    per_col = jnp.mean(sl1, axis=0, keepdims=True)                       # [1, tile]
    wrow = w_ref[0]                                                      # [1, tile]
    acc_wl[...] += wrow * per_col
    acc_w[...] += wrow

    @pl.when(j == pl.num_programs(1) - 1)
    def _():
        out_ref[0] = jnp.concatenate(
            [jnp.sum(acc_wl[...], axis=1, keepdims=True),
             jnp.sum(acc_w[...], axis=1, keepdims=True)], axis=0)        # [2, 1]


def dense_point_loss_sums(lra, tps, u_t, weight, *, width, lane_cap=8192):
    """Per-level dense point loss, reduced in-kernel to (sum(w*l), sum(w))."""
    bs, c, hw = lra.shape
    p = u_t.shape[1]
    tile, hw_pad = _lane_tiling(hw, lane_cap)
    pad = hw_pad - hw
    lra = lra.astype(jnp.float32)
    tps = tps.astype(jnp.float32)
    weight = weight.astype(jnp.float32)
    if pad:
        lra = jnp.pad(lra, ((0, 0), (0, 0), (0, pad)))
        tps = jnp.pad(tps, ((0, 0), (0, 0), (0, pad)))
        weight = jnp.pad(weight, ((0, 0), (0, pad)))   # zero weight masks padding
    weight = weight.reshape(bs, 1, hw_pad)
    ut_t = jnp.transpose(u_t).astype(jnp.float32)      # [P, C], tiny, kept resident
    n_chunks = hw_pad // tile
    out = pl.pallas_call(
        functools.partial(_dense_point_loss_kernel, width=int(width), tile=int(tile)),
        grid=(bs, n_chunks),
        in_specs=[pl.BlockSpec((1, c, tile), lambda b, j: (b, 0, j)),
                  pl.BlockSpec((1, c, tile), lambda b, j: (b, 0, j)),
                  pl.BlockSpec((p, c), lambda b, j: (0, 0)),
                  pl.BlockSpec((1, 1, tile), lambda b, j: (b, 0, j))],
        out_specs=pl.BlockSpec((1, 2, 1), lambda b, j: (b, 0, 0)),
        out_shape=jax.ShapeDtypeStruct((bs, 2, 1), jnp.float32),
        scratch_shapes=[pltpu.VMEM((1, tile), jnp.float32),
                        pltpu.VMEM((1, tile), jnp.float32)],
        compiler_params=pltpu.CompilerParams(
            dimension_semantics=("parallel", "arbitrary"),
            vmem_limit_bytes=VMEM_LIMIT),
    )(lra, tps, ut_t, weight)
    sums = jnp.sum(out[:, :, 0], axis=0)               # [2] over the batch
    return sums[0], sums[1]


def _lra_points_kernel(reg_ref, ut_ref, out_ref, *, width, step, tile):
    j = pl.program_id(1)
    pts = jnp.dot(ut_ref[...], reg_ref[0], preferred_element_type=jnp.float32)  # [P, tile]
    p_dim = pts.shape[0]
    col = j * tile + lax.broadcasted_iota(jnp.int32, (p_dim, tile), 1)
    row = lax.broadcasted_iota(jnp.int32, (p_dim, tile), 0)
    out_ref[0] = (pts + _xy_from_cols(col, row, width)) * step


def lra_points_level(reg, u_t, *, width, step, lane_cap=8192):
    """Sparse LRA point reconstruction, channel-major: out [bs, P, hw] lane-dense."""
    bs, c, hw = reg.shape
    p = u_t.shape[1]
    tile, hw_pad = _lane_tiling(hw, lane_cap)
    pad = hw_pad - hw
    reg = reg.astype(jnp.float32)
    if pad:
        reg = jnp.pad(reg, ((0, 0), (0, 0), (0, pad)))
    ut_t = jnp.transpose(u_t).astype(jnp.float32)
    n_chunks = hw_pad // tile
    out = pl.pallas_call(
        functools.partial(_lra_points_kernel, width=int(width),
                          step=float(step), tile=int(tile)),
        grid=(bs, n_chunks),
        in_specs=[pl.BlockSpec((1, c, tile), lambda b, j: (b, 0, j)),
                  pl.BlockSpec((p, c), lambda b, j: (0, 0))],
        out_specs=pl.BlockSpec((1, p, tile), lambda b, j: (b, 0, j)),
        out_shape=jax.ShapeDtypeStruct((bs, p, hw_pad), jnp.float32),
        compiler_params=pltpu.CompilerParams(
            dimension_semantics=("parallel", "parallel"),
            vmem_limit_bytes=VMEM_LIMIT),
    )(reg, ut_t)
    return out[:, :, :hw] if pad else out


def _bce_from_logits_kernel(x_ref, t_ref, out_ref):
    # BCE(sigmoid(x), t) with torch's log clamp at -100; one exp + one log per elem.
    x = x_ref[...]
    t = t_ref[...]
    e = jnp.exp(-jnp.abs(x))
    l1pe = jnp.log(1.0 + e)
    logp = jnp.maximum(jnp.minimum(x, 0.0) - l1pe, -100.0)
    log1mp = jnp.maximum(-jnp.maximum(x, 0.0) - l1pe, -100.0)
    out_ref[...] = -(t * logp + (1.0 - t) * log1mp)


def bce_from_logits(logits_flat, target_flat, target_tile=1024):
    n = logits_flat.shape[0]
    x2d, tile = _lane_pack(logits_flat, target_tile)
    t2d, _ = _lane_pack(target_flat, target_tile)
    r = x2d.shape[0]
    out = pl.pallas_call(
        _bce_from_logits_kernel,
        grid=(r // tile,),
        in_specs=[pl.BlockSpec((tile, 128), lambda i: (i, 0)),
                  pl.BlockSpec((tile, 128), lambda i: (i, 0))],
        out_specs=pl.BlockSpec((tile, 128), lambda i: (i, 0)),
        out_shape=jax.ShapeDtypeStruct((r, 128), jnp.float32),
        compiler_params=pltpu.CompilerParams(
            dimension_semantics=("parallel",), vmem_limit_bytes=VMEM_LIMIT),
    )(x2d, t2d)
    return out.reshape(-1)[:n]


def _focal_sum_kernel(x_ref, t_ref, out_ref, acc_ref, *, alpha, gamma,
                      n_valid, tile, chunks_per_par):
    par = pl.program_id(0)
    j = pl.program_id(1)

    @pl.when(j == 0)
    def _():
        acc_ref[...] = jnp.zeros_like(acc_ref)

    x = x_ref[...]
    t = t_ref[...]
    row = lax.broadcasted_iota(jnp.int32, x.shape, 0)
    lane = lax.broadcasted_iota(jnp.int32, x.shape, 1)
    gidx = ((par * chunks_per_par + j) * tile + row) * 128 + lane
    valid = (gidx < n_valid).astype(jnp.float32)        # masks lane padding, no HBM stream
    e = jnp.exp(-jnp.abs(x))                            # shared transcendental
    inv = 1.0 / (1.0 + e)
    p = jnp.where(x >= 0, inv, 1.0 - inv)               # sigmoid(x)
    ce = jnp.maximum(x, 0.0) - x * t + jnp.log(1.0 + e)
    p_t = p * t + (1.0 - p) * (1.0 - t)
    loss = ce * (1.0 - p_t) ** gamma
    alpha_t = alpha * t + (1.0 - alpha) * (1.0 - t)
    acc_ref[...] += jnp.sum(alpha_t * loss * valid, axis=0, keepdims=True)

    @pl.when(j == pl.num_programs(1) - 1)
    def _():
        out_ref[0] = acc_ref[...]


def sigmoid_focal_loss_sum(logits_flat, labels_flat, alpha=0.25, gamma=2,
                           target_tile=1024):
    """Lane-dense sigmoid focal loss; parallel axis gives v7x both TensorCores."""
    n = int(logits_flat.shape[0])
    rows = -(-n // 128)
    tile = target_tile if rows >= target_tile else _round_up(max(rows, 1), 8)
    chunks = -(-rows // tile)
    n_par = 2 if chunks >= 2 else 1
    chunks_per_par = -(-chunks // n_par)
    rows_pad = n_par * chunks_per_par * tile
    total = rows_pad * 128
    x2d = jnp.pad(jnp.asarray(logits_flat, jnp.float32), (0, total - n)).reshape(rows_pad, 128)
    t2d = jnp.pad(jnp.asarray(labels_flat, jnp.float32), (0, total - n)).reshape(rows_pad, 128)
    out = pl.pallas_call(
        functools.partial(_focal_sum_kernel, alpha=float(alpha), gamma=int(gamma),
                          n_valid=n, tile=int(tile),
                          chunks_per_par=int(chunks_per_par)),
        grid=(n_par, chunks_per_par),
        in_specs=[pl.BlockSpec((tile, 128),
                               lambda p, j: (p * chunks_per_par + j, 0)),
                  pl.BlockSpec((tile, 128),
                               lambda p, j: (p * chunks_per_par + j, 0))],
        out_specs=pl.BlockSpec((1, 1, 128), lambda p, j: (p, 0, 0)),
        out_shape=jax.ShapeDtypeStruct((n_par, 1, 128), jnp.float32),
        scratch_shapes=[pltpu.VMEM((1, 128), jnp.float32)],
        compiler_params=pltpu.CompilerParams(
            dimension_semantics=("parallel", "arbitrary"),
            vmem_limit_bytes=VMEM_LIMIT),
    )(x2d, t2d)
    return jnp.sum(out)


def _match_cost_kernel(logit_ref, po_ref, tgt_ref, mask_ref, out_ref, *,
                       cost_class, cost_point, alpha, gamma, inv_img,
                       num_tgt, num_coords):
    # logits/points arrive hw-on-lanes, so the transcendentals are lane-dense.
    x = logit_ref[0]                                        # [1, tile]
    p = jax.nn.sigmoid(x)
    neg_cost = (1.0 - alpha) * (p ** gamma) * (-jnp.log(1.0 - p + 1e-8))
    pos_cost = alpha * ((1.0 - p) ** gamma) * (-jnp.log(p + 1e-8))
    cls_cost = pos_cost - neg_cost                          # [1, tile]
    po = po_ref[0]                                          # [P, tile]
    tg = tgt_ref[0]                                         # [T, P]
    acc = jnp.zeros((num_tgt, po.shape[1]), jnp.float32)
    for k in range(num_coords):                             # static P loop, VPU-only
        acc = acc + jnp.abs(po[k:k + 1, :] - tg[:, k:k + 1])
    c = cost_class * cls_cost + cost_point * (acc * inv_img)
    out_ref[0] = jnp.where(mask_ref[0] <= 0.0, INF, c)      # [T, tile], lane-dense


def match_cost_batched(logits, points, tgts, masks, *, cost_class, cost_point,
                       alpha, gamma, img_size, lane_cap=8192):
    """Batched matcher cost matrix, hw-last: (bs, T_max, HW)."""
    bs, p, hw = points.shape
    t_max, pdim = tgts.shape[1], tgts.shape[2]
    tile, hw_pad = _lane_tiling(hw, lane_cap)
    pad = hw_pad - hw
    if pad:
        logits = jnp.pad(logits, ((0, 0), (0, 0), (0, pad)))
        points = jnp.pad(points, ((0, 0), (0, 0), (0, pad)))
        masks = jnp.pad(masks, ((0, 0), (0, 0), (0, pad)))  # mask=0 -> INF, sliced off
    n_chunks = hw_pad // tile
    cost = pl.pallas_call(
        functools.partial(_match_cost_kernel, cost_class=float(cost_class),
                          cost_point=float(cost_point), alpha=float(alpha),
                          gamma=int(gamma), inv_img=1.0 / float(img_size),
                          num_tgt=int(t_max), num_coords=int(p)),
        grid=(bs, n_chunks),
        in_specs=[pl.BlockSpec((1, 1, tile), lambda b, j: (b, 0, j)),
                  pl.BlockSpec((1, p, tile), lambda b, j: (b, 0, j)),
                  pl.BlockSpec((1, t_max, pdim), lambda b, j: (b, 0, 0)),
                  pl.BlockSpec((1, 1, tile), lambda b, j: (b, 0, j))],
        out_specs=pl.BlockSpec((1, t_max, tile), lambda b, j: (b, 0, j)),
        out_shape=jax.ShapeDtypeStruct((bs, t_max, hw_pad), jnp.float32),
        compiler_params=pltpu.CompilerParams(
            dimension_semantics=("parallel", "parallel"),
            vmem_limit_bytes=VMEM_LIMIT),
    )(logits.astype(jnp.float32), points.astype(jnp.float32),
      tgts.astype(jnp.float32), masks.astype(jnp.float32))
    return cost[:, :, :hw] if pad else cost


# ---------------------------------------------------------------------------
# LRALoss (JAX glue around the Pallas kernels)
# ---------------------------------------------------------------------------
class LRALoss:
    def __init__(self, num_coefficients, U_t, ohem_ratio=3.0, with_weight=True,
                 with_area_weight=True, steps=(8, 16, 32)):
        self.eps = 1e-6
        self.ohem_ratio = ohem_ratio
        self.with_center_weight = with_weight
        self.with_area_weight = with_area_weight
        self.steps = list(steps)
        self.num_coefficients = num_coefficients
        self.U_t = jnp.asarray(U_t, jnp.float32)      # deterministic init (no .npz load)
        self.num_classes = 1
        self.focal_loss_alpha = 0.25
        self.focal_loss_gamma = 2
        self.cost_class = 0.5
        self.cost_point = 1.0
        self.weight_dict = {'loss_ce_sparse': 2, 'loss_point_sparse': 0.1,
                            'loss_ce_dense': 1, 'loss_point_dense': 4}

    # ---------------- OHEM (device-side; exact dynamic-k) ----------------
    def _ohem_from_bce(self, bce, target, train_mask):
        pos = (target * train_mask) > 0
        neg = ((1.0 - target) * train_mask) > 0
        n_pos = jnp.sum(pos.astype(jnp.float32))
        n_neg_avail = jnp.sum(neg.astype(jnp.float32))
        loss_pos = jnp.where(n_pos > 0, jnp.sum(jnp.where(pos, bce, 0.0)), 0.0)
        n_neg = jnp.where(n_pos > 0,
                          jnp.minimum(n_neg_avail,
                                      jnp.floor(self.ohem_ratio * n_pos)),
                          jnp.minimum(100.0, n_neg_avail))
        # TODO(synk): exact dynamic-k hard-negative selection needs the full sort;
        # a bounded lax.top_k would change semantics when n_neg exceeds the cap.
        neg_sorted = jnp.sort(jnp.where(neg, bce, -1.0))[::-1]   # BCE >= 0
        rank = jnp.arange(neg_sorted.shape[0], dtype=jnp.float32)
        loss_neg = jnp.sum(jnp.where(rank < n_neg, neg_sorted, 0.0))
        denom = n_pos + n_neg
        return jnp.where(denom > 0,
                         (loss_pos + loss_neg) / jnp.maximum(denom, 1.0), 0.0)

    # ---------------- dense branch ----------------
    def _dense_branch(self, preds, gts, pad_polygon_areas):
        C = self.num_coefficients
        loss_ce_dense = jnp.float32(0.0)
        loss_point_dense = jnp.float32(0.0)
        tr_train_mask_levels, logits_list, tr_list, train_list, level_rows = \
            [], [], [], [], []

        for li, (pred, gt) in enumerate(zip(preds, gts)):
            bs, _, h, w = gt.shape
            hw = h * w
            # channel-major slices: no NCHW->NHWC transpose, hw stays on lanes
            cls_logit = pred[0][:, 0, :, :].reshape(bs * hw)
            lra = pred[1].reshape(bs, C, hw)
            tps = gt[:, 3:, :, :].reshape(bs, C, hw)

            if self.with_area_weight:
                tr_idx = gt[:, 0, :, :].astype(jnp.int32).reshape(bs, hw)
                tr_mask = (tr_idx != 0).astype(jnp.float32)
            else:
                tr_mask = gt[:, 0, :, :].reshape(bs, hw)
            tcl_mask = gt[:, 1, :, :].reshape(bs, hw)
            train_mask = gt[:, 2, :, :].reshape(bs, hw)
            tr_train = (train_mask * tr_mask) > 0
            tr_train_mask_levels.append(tr_train.astype(jnp.float32))

            if self.with_center_weight:
                weight = (tr_mask + tcl_mask) * 0.5
            else:
                weight = jnp.ones_like(tr_mask)
            if self.with_area_weight:
                # clamp explicitly: background rows (tr_idx==0) would wrap to -1
                inst_idx = jnp.clip(tr_idx - 1, 0, pad_polygon_areas.shape[1] - 1)
                pos_area = jnp.take_along_axis(pad_polygon_areas, inst_idx, axis=1)
                pos_area = pos_area / float(self.steps[li] ** 2)
                pos_area = jnp.where(pos_area <= 1.0, INF, pos_area)
                num_instance = jnp.sum((pad_polygon_areas > 0).astype(jnp.float32))
                inv_ni = jnp.where(num_instance > 0, 1.0 / num_instance, 0.0)
                weight = weight * (1.0 / pos_area) * inv_ni
            else:
                num_pos = jnp.sum(tr_train.astype(jnp.float32))
                weight = weight * jnp.where(num_pos > 0, 1.0 / num_pos, 0.0)
            weight = jnp.where(tr_train, weight, 0.0)   # branchless num_pos>0 gate

            sum_wl, sum_w = dense_point_loss_sums(lra, tps, self.U_t, weight,
                                                  width=w)
            # reference applies the weight sum a second time:
            #   loss_point = sum(w) * sum(w * smooth_l1(...).mean(-1))
            loss_point_dense = loss_point_dense + sum_wl * sum_w

            logits_list.append(cls_logit)
            tr_list.append(tr_mask.reshape(-1))
            train_list.append(train_mask.reshape(-1))
            level_rows.append(bs * hw)

        tr_all = jnp.concatenate(tr_list)
        train_all = jnp.concatenate(train_list)
        bce_all = bce_from_logits(jnp.concatenate(logits_list), tr_all)
        off = 0
        for n in level_rows:
            sl = slice(off, off + n)
            off += n
            loss_ce_dense = loss_ce_dense + self._ohem_from_bce(
                bce_all[sl], tr_all[sl], train_all[sl])

        tr_train_masks = jnp.concatenate(tr_train_mask_levels, axis=1)
        return loss_ce_dense, loss_point_dense, tr_train_masks

    # ---------------- sparse branch (matcher + criterion) ----------------
    def matcher(self, outputs, targets):
        logits = outputs['pred_logits']                    # [bs, 1, HW]
        points = outputs['pred_points']                    # [bs, P, HW]
        masks = outputs['tr_train_masks']                  # [bs, HW]
        bs, pdim, hw = points.shape
        t_counts = [int(t['labels'].shape[0]) for t in targets]
        t_max = max(t_counts)
        tgt_pad = np.zeros((bs, t_max, pdim), np.float32)
        for i, t in enumerate(targets):
            tp = np.asarray(t['points'], np.float32)
            tgt_pad[i, :tp.shape[0]] = tp
        img_size = float(targets[0]['image_size'])

        cost = match_cost_batched(
            logits, points, jnp.asarray(tgt_pad), masks.reshape(bs, 1, hw),
            cost_class=self.cost_class, cost_point=self.cost_point,
            alpha=self.focal_loss_alpha, gamma=self.focal_loss_gamma,
            img_size=img_size)
        cost_np = np.asarray(cost)                         # single device->host copy
        # TODO(synk): Hungarian assignment has no Pallas equivalent; solved on host.
        indices = []
        for i in range(bs):
            src, tgt_ind = linear_sum_assignment(cost_np[i, :t_counts[i], :].T)
            indices.append((src.astype(np.int64), tgt_ind.astype(np.int64)))
        return indices

    def loss_labels(self, outputs, targets, indices, num_inst):
        logits = outputs['pred_logits']                    # [bs, 1, hw]
        bs, k, hw = logits.shape
        assert k == 1
        batch_idx = np.concatenate(
            [np.full_like(s, i) for i, (s, _) in enumerate(indices)])
        src_idx = np.concatenate([s for s, _ in indices])
        target_classes_o = np.concatenate(
            [np.asarray(t['labels'])[J] for t, (_, J) in zip(targets, indices)])
        target_classes = np.full((bs, hw), self.num_classes, dtype=np.int64)
        target_classes[batch_idx, src_idx] = target_classes_o
        labels = (target_classes.reshape(-1) != self.num_classes).astype(np.float32)
        class_loss = sigmoid_focal_loss_sum(
            logits.reshape(-1), jnp.asarray(labels),
            alpha=self.focal_loss_alpha,
            gamma=self.focal_loss_gamma) / num_inst
        return {'loss_ce_sparse': class_loss}

    def loss_points(self, outputs, targets, indices, num_inst):
        points = outputs['pred_points']                    # [bs, P, hw]
        batch_idx = np.concatenate(
            [np.full_like(s, i) for i, (s, _) in enumerate(indices)])
        src_idx = np.concatenate([s for s, _ in indices])
        src_sel = points[jnp.asarray(batch_idx), :, jnp.asarray(src_idx)]  # [M, P]
        target_points = jnp.concatenate(
            [jnp.asarray(t['points'], jnp.float32)[jnp.asarray(J)]
             for t, (_, J) in zip(targets, indices)], axis=0)
        # handful of matched rows: plain XLA beats a Pallas launch here
        d = src_sel - target_points
        ad = jnp.abs(d)
        sl1 = jnp.where(ad < 1.0, 0.5 * d * d, ad - 0.5)
        loss = jnp.sum(jnp.mean(sl1, axis=-1)) / num_inst
        return {'loss_point_sparse': loss}

    def criterion_forward(self, outputs, targets):
        indices = self.matcher(outputs, targets)
        num_inst = max(float(sum(len(t['labels']) for t in targets)), 1.0)
        losses = {}
        losses.update(self.loss_labels(outputs, targets, indices, num_inst))
        losses.update(self.loss_points(outputs, targets, indices, num_inst))
        return losses

    # ---------------- top-level forward ----------------
    def forward(self, preds, _, p3_maps, p4_maps, p5_maps,
                polygons_area=None, lra_polys=None, **kwargs):
        assert isinstance(preds, list)
        C = self.num_coefficients
        gts = [jnp.asarray(m, jnp.float32) for m in (p3_maps, p4_maps, p5_maps)]

        if self.with_area_weight:
            assert polygons_area is not None
            max_np = max(len(p) for p in polygons_area)
            pad = np.zeros((len(polygons_area), max(max_np, 1)), np.float32)
            for bi, po in enumerate(polygons_area):
                if len(po) == 0:
                    continue
                pad[bi, :len(po)] = np.asarray(po)
            pad_polygon_areas = jnp.asarray(pad)
        else:
            pad_polygon_areas = None

        # ---- dense branch ----
        loss_ce_dense, loss_point_dense, tr_train_masks = self._dense_branch(
            preds, gts, pad_polygon_areas)

        # ---- sparse branch: channel-major LRA reconstruction, [bs, P, hw] ----
        cls_list, pts_list = [], []
        for li, pred in enumerate(preds):
            bs, _, h, w = pred[2].shape
            reg_sp = pred[3].reshape(bs, C, h * w)
            pts_list.append(lra_points_level(reg_sp, self.U_t, width=w,
                                             step=self.steps[li]))
            cls_list.append(pred[2][:, 0:1, :, :].reshape(bs, 1, h * w))
        # kept channel-major ([bs, P/1, HW]): this IS the reference's
        # permute(0,2,1) layout, so no transpose is needed anywhere.
        reg_points_sparse = jnp.concatenate(pts_list, axis=-1)
        clsass_sparse = jnp.concatenate(cls_list, axis=-1)

        new_targets, keep, cnt = [], [], 0
        image_size = p3_maps.shape[-1] * self.steps[0]
        for i in range(len(lra_polys)):
            cnt += lra_polys[i].shape[0]
            if lra_polys[i].shape[0] == 0:
                continue   # batch entry dropped (mirrors reference removal)
            keep.append(i)
            new_targets.append({'labels': np.zeros(lra_polys[i].shape[0], np.int64),
                                'image_size': float(image_size),
                                'points': np.asarray(lra_polys[i], np.float32)})

        if cnt > 0:
            keep_idx = np.asarray(keep, np.int32)
            outputs = {'pred_logits': clsass_sparse[keep_idx],
                       'pred_points': reg_points_sparse[keep_idx],
                       'tr_train_masks': tr_train_masks[keep_idx]}
            loss_dict = self.criterion_forward(outputs, new_targets)
        else:
            z = reg_points_sparse.sum() * 0.0
            loss_dict = {'loss_ce_sparse': z, 'loss_point_sparse': z}

        loss_dict['loss_ce_dense'] = loss_ce_dense
        loss_dict['loss_point_dense'] = loss_point_dense
        for k in list(loss_dict.keys()):
            if k in self.weight_dict:
                loss_dict[k] = loss_dict[k] * self.weight_dict[k]
        return loss_dict


# ---------------------------------------------------------------------------
if __name__ == "__main__":
    key = jax.random.PRNGKey(0)
    bs = 2
    C = 8                    # num_coefficients
    P = 16                   # reconstructed point vector (8 (x, y) pairs)
    steps = [8, 16, 32]
    sizes = [(16, 16), (8, 8), (4, 4)]
    image_size = sizes[0][1] * steps[0]     # 128

    keys = jax.random.split(key, 20)
    u_t = jax.random.normal(keys[0], (C, P), jnp.float32) * 0.2   # stands in for the .npz PCA basis

    preds = []
    kidx = 1
    for (h, w) in sizes:
        cls_dense = jax.random.normal(keys[kidx], (bs, 2, h, w), jnp.float32); kidx += 1
        reg_dense = jax.random.normal(keys[kidx], (bs, C, h, w), jnp.float32) * 0.5; kidx += 1
        cls_sp = jax.random.normal(keys[kidx], (bs, 2, h, w), jnp.float32); kidx += 1
        reg_sp = jax.random.normal(keys[kidx], (bs, C, h, w), jnp.float32) * 0.5; kidx += 1
        preds.append([cls_dense, reg_dense, cls_sp, reg_sp])

    polys_per_img = [3, 2]

    def make_gt(k, h, w):
        gt = np.zeros((bs, 3 + C, h, w), np.float32)
        for b in range(bs):
            npoly = polys_per_img[b]
            for pi in range(npoly):
                y0 = (pi * h) // (npoly + 1)
                y1 = min(h, y0 + max(2, h // 8))
                gt[b, 0, y0:y1, : max(2, w // 2)] = pi + 1
            gt[b, 1] = (gt[b, 0] > 0) * (np.arange(w)[None, :] % 2 == 0)
            gt[b, 2] = 1.0
            gt[b, 2, -1, -1] = 0.0
        gt[:, 3:] = np.asarray(jax.random.normal(k, (bs, C, h, w), jnp.float32)) * 0.5
        return jnp.asarray(gt)

    p3_maps = make_gt(keys[kidx], *sizes[0]); kidx += 1
    p4_maps = make_gt(keys[kidx], *sizes[1]); kidx += 1
    p5_maps = make_gt(keys[kidx], *sizes[2]); kidx += 1

    polygons_area = [np.array([900.0, 1400.0, 700.0], np.float32),
                     np.array([1600.0, 1100.0], np.float32)]
    lra_polys = [
        np.asarray(jax.random.uniform(keys[kidx], (3, P)) * image_size, np.float32),
        np.asarray(jax.random.uniform(keys[kidx + 1], (2, P)) * image_size, np.float32),
    ]

    loss_mod = LRALoss(num_coefficients=C, U_t=u_t, steps=steps)
    loss_dict = loss_mod.forward(preds, None, p3_maps, p4_maps, p5_maps,
                                 polygons_area=polygons_area, lra_polys=lra_polys)
    flat = jnp.stack([jnp.asarray(v, jnp.float32).reshape(()) for v in loss_dict.values()])
    jax.block_until_ready(flat)
    print("KERNEL_OK")
</pallas_src>

<mosaic_0001>
module attributes {stable_mosaic.version = 11 : i64} {
  func.func @_dense_point_loss_kernel(%arg0: i32, %arg1: i32, %arg2: memref<1x8x256xf32, #tpu.memory_space<vmem>>, %arg3: memref<1x8x256xf32, #tpu.memory_space<vmem>>, %arg4: memref<16x8xf32, #tpu.memory_space<vmem>>, %arg5: memref<1x1x256xf32, #tpu.memory_space<vmem>>, %arg6: memref<1x2x1xf32, #tpu.memory_space<vmem>>, %arg7: memref<1x256xf32, #tpu.memory_space<vmem>>, %arg8: memref<1x256xf32, #tpu.memory_space<vmem>>) attributes {dimension_semantics = [#tpu.dimension_semantics<parallel>, #tpu.dimension_semantics<arbitrary>], iteration_bounds = array<i64: 2, 1>, scalar_prefetch = 0 : i64, scratch_operands = 2 : i64, tpu.core_type = #tpu.core_type<tc>, window_params = [{transform_indices = @transform_0, window_bounds = array<i64: 1, 8, 256>}, {transform_indices = @transform_1, window_bounds = array<i64: 1, 8, 256>}, {pipeline_mode = #tpu.pipeline_mode<synchronous>, transform_indices = @transform_2, window_bounds = array<i64: 16, 8>}, {transform_indices = @transform_3, window_bounds = array<i64: 1, 1, 256>}, {transform_indices = @transform_4, window_bounds = array<i64: 1, 2, 1>}]} {
    %c0_i32 = arith.constant 0 : i32
    %0 = arith.cmpi eq, %arg1, %c0_i32 : i32
    %1 = arith.extui %0 : i1 to i32
    %c0_i32_0 = arith.constant 0 : i32
    %2 = arith.cmpi ne, %1, %c0_i32_0 : i32
    scf.if %2 {
      %cst_33 = arith.constant 0.000000e+00 : f32
      %67 = vector.broadcast %cst_33 : f32 to vector<1x256xf32>
      %c0_34 = arith.constant 0 : index
      %c0_35 = arith.constant 0 : index
      %68 = vector.load %arg7[%c0_34, %c0_35] : memref<1x256xf32, #tpu.memory_space<vmem>>, vector<1x256xf32>
      tpu.vector_store %arg7[%c0_34, %c0_35], %67 {strides = array<i32>} : memref<1x256xf32, #tpu.memory_space<vmem>>, vector<1x256xf32>,
      %cst_36 = arith.constant 0.000000e+00 : f32
      %69 = vector.broadcast %cst_36 : f32 to vector<1x256xf32>
      %c0_37 = arith.constant 0 : index
      %c0_38 = arith.constant 0 : index
      %70 = vector.load %arg8[%c0_37, %c0_38] : memref<1x256xf32, #tpu.memory_space<vmem>>, vector<1x256xf32>
      tpu.vector_store %arg8[%c0_37, %c0_38], %69 {strides = array<i32>} : memref<1x256xf32, #tpu.memory_space<vmem>>, vector<1x256xf32>,
    } else {
    }
    %c0 = arith.constant 0 : index
    %c0_1 = arith.constant 0 : index
    %c0_2 = arith.constant 0 : index
    %3 = vector.load %arg3[%c0, %c0_1, %c0_2] : memref<1x8x256xf32, #tpu.memory_space<vmem>>, vector<1x8x256xf32>
    %4 = vector.shape_cast %3 : vector<1x8x256xf32> to vector<8x256xf32>
    %c0_3 = arith.constant 0 : index
    %c0_4 = arith.constant 0 : index
    %c0_5 = arith.constant 0 : index
    %5 = vector.load %arg2[%c0_3, %c0_4, %c0_5] : memref<1x8x256xf32, #tpu.memory_space<vmem>>, vector<1x8x256xf32>
    %6 = vector.shape_cast %5 : vector<1x8x256xf32> to vector<8x256xf32>
    %7 = arith.subf %4, %6 : vector<8x256xf32>
    %c0_6 = arith.constant 0 : index
    %c0_7 = arith.constant 0 : index
    %8 = vector.load %arg4[%c0_6, %c0_7] : memref<16x8xf32, #tpu.memory_space<vmem>>, vector<16x8xf32>
    %cst = arith.constant dense<0.000000e+00> : vector<16x256xf32>
    %9 = tpu.matmul %8, %7, %cst {dimension_numbers = #tpu.dot_dimension_numbers<[1], [0], [0], [1], [0, 0, 1, 1], [], []>} : vector<16x8xf32>, vector<8x256xf32>, vector<16x256xf32> -> vector<16x256xf32>
    %c256_i32 = arith.constant 256 : i32
    %10 = arith.muli %arg1, %c256_i32 : i32
    %11 = tpu.iota {dimensions = array<i32: 1>} : vector<16x256xi32>
    %12 = vector.broadcast %10 : i32 to vector<16x256xi32>
    %13 = arith.addi %12, %11 : vector<16x256xi32>
    %14 = tpu.iota {dimensions = array<i32: 0>} : vector<16x256xi32>
    %15 = arith.sitofp %13 : vector<16x256xi32> to vector<16x256xf32>
    %cst_8 = arith.constant 1.600000e+01 : f32
    %16 = vector.broadcast %cst_8 : f32 to vector<16x256xf32>
    %17 = arith.divf %15, %16 : vector<16x256xf32>
    %18 = math.floor %17 : vector<16x256xf32>
    %cst_9 = arith.constant 1.600000e+01 : f32
    %19 = vector.broadcast %cst_9 : f32 to vector<16x256xf32>
    %20 = arith.mulf %18, %19 : vector<16x256xf32>
    %21 = arith.subf %15, %20 : vector<16x256xf32>
    %c2_i32 = arith.constant 2 : i32
    %c0_i32_10 = arith.constant 0 : i32
    %22 = arith.cmpi eq, %c2_i32, %c0_i32_10 : i32
    %c1_i32 = arith.constant 1 : i32
    %23 = arith.select %22, %c1_i32, %c2_i32 : i32
    %24 = vector.broadcast %23 : i32 to vector<16x256xi32>
    %25 = arith.remsi %14, %24 : vector<16x256xi32>
    %c0_i32_11 = arith.constant 0 : i32
    %26 = vector.broadcast %c0_i32_11 : i32 to vector<16x256xi32>
    %27 = arith.cmpi ne, %25, %26 : vector<16x256xi32>
    %c0_i32_12 = arith.constant 0 : i32
    %28 = vector.broadcast %c0_i32_12 : i32 to vector<16x256xi32>
    %29 = arith.cmpi slt, %25, %28 : vector<16x256xi32>
    %c0_i32_13 = arith.constant 0 : i32
    %30 = arith.cmpi slt, %23, %c0_i32_13 : i32
    %31 = vector.broadcast %30 : i1 to vector<16x256xi1>
    %32 = vector.broadcast %31 : vector<16x256xi1> to vector<16x256xi1>
    %33 = arith.xori %29, %32 : vector<16x256xi1>
    %34 = arith.andi %33, %27 : vector<16x256xi1>
    %35 = vector.broadcast %23 : i32 to vector<16x256xi32>
    %36 = arith.addi %25, %35 : vector<16x256xi32>
    %37 = arith.select %34, %36, %25 : vector<16x256xi1>, vector<16x256xi32>
    %c0_i32_14 = arith.constant 0 : i32
    %38 = vector.broadcast %c0_i32_14 : i32 to vector<16x256xi32>
    %39 = arith.cmpi eq, %37, %38 : vector<16x256xi32>
    %40 = arith.select %39, %21, %18 : vector<16x256xi1>, vector<16x256xf32>
    %41 = arith.subf %9, %40 : vector<16x256xf32>
    %42 = math.absf %41 : vector<16x256xf32>
    %cst_15 = arith.constant 1.000000e+00 : f32
    %43 = vector.broadcast %cst_15 : f32 to vector<16x256xf32>
    %44 = arith.cmpf olt, %42, %43 : vector<16x256xf32>
    %cst_16 = arith.constant 5.000000e-01 : f32
    %45 = vector.broadcast %cst_16 : f32 to vector<16x256xf32>
    %46 = arith.mulf %45, %41 : vector<16x256xf32>
    %47 = arith.mulf %46, %41 : vector<16x256xf32>
    %cst_17 = arith.constant 5.000000e-01 : f32
    %48 = vector.broadcast %cst_17 : f32 to vector<16x256xf32>
    %49 = arith.subf %42, %48 : vector<16x256xf32>
    %50 = arith.select %44, %47, %49 : vector<16x256xi1>, vector<16x256xf32>
    %cst_18 = arith.constant dense<0.000000e+00> : vector<256xf32>
    %51 = vector.multi_reduction <add>, %50, %cst_18 [0] : vector<16x256xf32> to vector<256xf32>
    %52 = vector.shape_cast %51 : vector<256xf32> to vector<1x256xf32>
    %cst_19 = arith.constant 1.600000e+01 : f32
    %53 = vector.broadcast %cst_19 : f32 to vector<1x256xf32>
    %54 = arith.divf %52, %53 : vector<1x256xf32>
    %c0_20 = arith.constant 0 : index
    %c0_21 = arith.constant 0 : index
    %c0_22 = arith.constant 0 : index
    %55 = vector.load %arg5[%c0_20, %c0_21, %c0_22] : memref<1x1x256xf32, #tpu.memory_space<vmem>>, vector<1x1x256xf32>
    %56 = vector.shape_cast %55 : vector<1x1x256xf32> to vector<1x256xf32>
    %c0_23 = arith.constant 0 : index
    %c0_24 = arith.constant 0 : index
    %57 = vector.load %arg7[%c0_23, %c0_24] : memref<1x256xf32, #tpu.memory_space<vmem>>, vector<1x256xf32>
    %58 = arith.mulf %56, %54 : vector<1x256xf32>
    %59 = arith.addf %57, %58 : vector<1x256xf32>
    %c0_25 = arith.constant 0 : index
    %c0_26 = arith.constant 0 : index
    %60 = vector.load %arg7[%c0_25, %c0_26] : memref<1x256xf32, #tpu.memory_space<vmem>>, vector<1x256xf32>
    tpu.vector_store %arg7[%c0_25, %c0_26], %59 {strides = array<i32>} : memref<1x256xf32, #tpu.memory_space<vmem>>, vector<1x256xf32>,
    %c0_27 = arith.constant 0 : index
    %c0_28 = arith.constant 0 : index
    %61 = vector.load %arg8[%c0_27, %c0_28] : memref<1x256xf32, #tpu.memory_space<vmem>>, vector<1x256xf32>
    %62 = arith.addf %61, %56 : vector<1x256xf32>
    %c0_29 = arith.constant 0 : index
    %c0_30 = arith.constant 0 : index
    %63 = vector.load %arg8[%c0_29, %c0_30] : memref<1x256xf32, #tpu.memory_space<vmem>>, vector<1x256xf32>
    tpu.vector_store %arg8[%c0_29, %c0_30], %62 {strides = array<i32>} : memref<1x256xf32, #tpu.memory_space<vmem>>, vector<1x256xf32>,
    %c0_i32_31 = arith.constant 0 : i32
    %64 = arith.cmpi eq, %arg1, %c0_i32_31 : i32
    %65 = arith.extui %64 : i1 to i32
    %c0_i32_32 = arith.constant 0 : i32
    %66 = arith.cmpi ne, %65, %c0_i32_32 : i32
    scf.if %66 {
      %c0_33 = arith.constant 0 : index
      %c0_34 = arith.constant 0 : index
      %67 = vector.load %arg7[%c0_33, %c0_34] : memref<1x256xf32, #tpu.memory_space<vmem>>, vector<1x256xf32>
      %cst_35 = arith.constant dense<0.000000e+00> : vector<1xf32>
      %68 = vector.multi_reduction <add>, %67, %cst_35 [1] : vector<1x256xf32> to vector<1xf32>
      %69 = vector.shape_cast %68 : vector<1xf32> to vector<1x1xf32>
      %c0_36 = arith.constant 0 : index
      %c0_37 = arith.constant 0 : index
      %70 = vector.load %arg8[%c0_36, %c0_37] : memref<1x256xf32, #tpu.memory_space<vmem>>, vector<1x256xf32>
      %cst_38 = arith.constant dense<0.000000e+00> : vector<1xf32>
      %71 = vector.multi_reduction <add>, %70, %cst_38 [1] : vector<1x256xf32> to vector<1xf32>
      %72 = vector.shape_cast %71 : vector<1xf32> to vector<1x1xf32>
      %73 = tpu.concatenate %69, %72 in 0 : vector<1x1xf32>, vector<1x1xf32> -> vector<2x1xf32>
      %c0_39 = arith.constant 0 : index
      %c0_40 = arith.constant 0 : index
      %c0_41 = arith.constant 0 : index
      %74 = vector.load %arg6[%c0_39, %c0_40, %c0_41] : memref<1x2x1xf32, #tpu.memory_space<vmem>>, vector<1x2x1xf32>
      %75 = vector.shape_cast %74 : vector<1x2x1xf32> to vector<2x1xf32>
      %76 = vector.shape_cast %73 : vector<2x1xf32> to vector<1x2x1xf32>
      tpu.vector_store %arg6[%c0_39, %c0_40, %c0_41], %76 {strides = array<i32>} : memref<1x2x1xf32, #tpu.memory_space<vmem>>, vector<1x2x1xf32>,
    } else {
    }
    return
  }
  func.func @transform_0(%arg0: i32, %arg1: i32) -> (i32, i32, i32) {
    %c0_i32 = arith.constant 0 : i32
    %c0_i32_0 = arith.constant 0 : i32
    return %arg0, %c0_i32, %arg1 : i32, i32, i32
  }
  func.func @transform_1(%arg0: i32, %arg1: i32) -> (i32, i32, i32) {
    %c0_i32 = arith.constant 0 : i32
    %c0_i32_0 = arith.constant 0 : i32
    return %arg0, %c0_i32, %arg1 : i32, i32, i32
  }
  func.func @transform_2(%arg0: i32, %arg1: i32) -> (i32, i32) {
    %c0_i32 = arith.constant 0 : i32
    %c0_i32_0 = arith.constant 0 : i32
    %c0_i32_1 = arith.constant 0 : i32
    return %c0_i32, %c0_i32_0 : i32, i32
  }
  func.func @transform_3(%arg0: i32, %arg1: i32) -> (i32, i32, i32) {
    %c0_i32 = arith.constant 0 : i32
    %c0_i32_0 = arith.constant 0 : i32
    return %arg0, %c0_i32, %arg1 : i32, i32, i32
  }
  func.func @transform_4(%arg0: i32, %arg1: i32) -> (i32, i32, i32) {
    %c0_i32 = arith.constant 0 : i32
    %c0_i32_0 = arith.constant 0 : i32
    %c0_i32_1 = arith.constant 0 : i32
    return %arg0, %c0_i32, %c0_i32_0 : i32, i32, i32
  }
}

</mosaic_0001>

<bundles_post_ra>
// kernel: tpu_custom_call.1
= control target key start
LH: loop header
LB: loop body
LE: loop exit
PB: predicated region body
PF: predicated region fallthrough
CT: control target
= control target key end

     0   :  { %9 = vsyncpa [#allocation5], 0  ;;  %s1153_s0 = inlined_call_operand.hbm [shape: f32[2,8,256], index: 0, kind: input, shape index: {}]   ;;  %s1154_s1 = inlined_call_operand.hbm [shape: f32[2,8,256], index: 1, kind: input, shape index: {}]   ;;  %s1155_s2 = inlined_call_operand.vmem [shape: f32[16,8], index: 2, kind: input, shape index: {}]   ;;  %s1156_s3 = inlined_call_operand.vmem [shape: f32[2,1,256], index: 3, kind: input, shape index: {}]   ;;  %s1157_s4 = inlined_call_operand.vmem [shape: f32[2,2,1], index: 4, kind: output, shape index: {}]  }
   0x1   :  { %11 = vsyncpa [#allocation5 + $0x1], 0 }
   0x2   :  { %12 = vsyncpa [#allocation7], 0 }
   0x3   :  { %14 = vsyncpa [#allocation7 + $0x1], 0  ;;  %s929_s15 = smov 0   ;;  %s931_s16 = smov 0  }
   0x4   :  { %s933_s17 = smov 0   ;;  %s935_s18 = smov 0  }
   0x5   :  { %s937_s19 = smov 0   ;;  %s939_s20 = smov 0  }
   0x6 LB: > { %s695_s21 = sadd.s32 4294967295, %s898_s20   ;;  %s32_s22 = sadd.s32 1, %s894_s19  ;;  %s898_s20 = sphi %s939_s20, %s20_s20   ;;  %s894_s19 = sphi %s937_s19, %s1173_s19   ;;  %s890_s18 = sphi %s935_s18, %s1172_s18   ;;  %s886_s17 = sphi %s933_s17, %s1171_s17   ;;  %s882_s16 = sphi %s931_s16, %s1170_s16   ;;  %s878_s15 = sphi %s929_s15, %s1169_s15  }
   0x7   : > { %p34_p0 = scmp.ge.s32.totalorder %s32_s22, 2  ;;  %s41_s23 = sadd.s32 1, %s886_s17 }
   0x8   : > { %p48_p1 = scmp.ne.s32.totalorder %s886_s17, %s882_s16  ;;  %p49_p2 = scmp.eq.s32.totalorder %s898_s20, 0 }
   0x9   : > { %s1175_s22 = smov (%p34_p0, %s32_s22), 0  ;;  %p54_p4 = scmp.ne.s32.totalorder %s882_s16, %s878_s15 }
   0xa   : > { %p965_p3 = por %p49_p2, %p48_p1  ;;  %s36_s25 = ssub.s32 %s894_s19, %s1175_s22 }
   0xb   : > { %p55_p5 = scmp.eq.s32.totalorder %s695_s21, 0  ;;  %p39_p6 = scmp.eq.s32.totalorder %s36_s25, 0 }
   0xc   : > { %p733_p8 = scmp.lt.s32.totalorder %s898_s20, 2  ;;  %s981_s28 = sand.u32 1, %s886_s17  }
   0xd   : > { %p972_p7 = por %p55_p5, %p54_p4  ;;  %s718_s29 = sshll.u32 %s894_s19, 8 }
   0xe   : > { %s978_s27 = scalar_select %p39_p6, %s886_s17, %s41_s23  }
   0xf   : > { %s1160_s26 = scalar_select %p972_p7, 1, 0 }
  0x10   : > { %s699_s30 = sshll.u32 %s981_s28, 4  ;;  %s990_s7 = scalar_lea.hbm %s1153_s0, %s718_s29 }
  0x11   : > { %s188_s8 = scalar_lea.vmem [#allocation4], %s699_s30  ;;  %p996_p9 = pnand %p733_p8, %p965_p3 }
  0x12   : > { %s198_s9 = sshll.u32 %s188_s8, 4  ;;  %s185_s11 = scalar_lea.sflag [#allocation5], %s981_s28  ;;  %s1000_s9 = int_to_ptr.vmem [resolvable:$true] %s198_s9 }
  0x13   : > { %s784_s12 = scalar_lea.hbm %s990_s7, 256  ;;  %p786_p13 = pneg %p996_p9 }
  0x14   : > { %p785_p12 = scmp.ne.s32.totalorder %s990_s7, %s784_s12  ;;  %s789_s15 = scalar_lea.hbm %s1153_s0, 512 }
  0x15   : > { %p790_p2 = scmp.lt.u32.totalorder %s990_s7, %s1153_s0  ;;  %p791_p3 = scmp.lt.u32.totalorder %s789_s15, %s784_s12 }
  0x16   : > { %p787_p0 = pnand %p786_p13, %p785_p12  ;;  %p793_p5 = scmp.lt.u32.totalorder %s784_s12, %s990_s7 }
  0x17   : > { %p792_p4 = por %p791_p3, %p790_p2 }
  0x18   : > { %p788_p1 = pneg %p787_p0 }
  0x19   : > { %p794_p6 = por %p793_p5, %p792_p4 }
  0x1b   : > { %p795_p8 = pnand %p794_p6, %p788_p1 }
  0x1d   : > { %798 = shalt.err (!%p795_p8)
}
  0x1e   : > { %s799_s24 = scalar_lea.vmem %s1000_s9, 256  ;;  %s900_s25 = smov [#allocation4]  }
  0x1f   : > { %p800_p12 = scmp.ne.s32.totalorder %s1000_s9, %s799_s24  ;;  %s804_s5 = sshll.u32 %s900_s25, 4  ;;  %s805_s5 = int_to_ptr.vmem [resolvable:$false] %s804_s5 }
  0x20   : > { %s806_s6 = scalar_lea.vmem %s805_s5, 512  ;;  %p807_p11 = scmp.lt.s32.totalorder %s1000_s9, %s805_s5 }
  0x21   : > { %p802_p0 = pnand %p800_p12, %p786_p13  ;;  %p808_p2 = scmp.lt.s32.totalorder %s806_s6, %s799_s24 }
  0x23   : > { %p803_p10 = pneg %p802_p0  ;;  %p809_p3 = por %p808_p2, %p807_p11 }
  0x25   : > { %p810_p4 = pnand %p809_p3, %p803_p10 }
  0x27   : > { %813 = shalt.err (!%p810_p4)
}
  0x28   : > { %729 = dma.hbm_to_vmem [thread:$0]  (!%p996_p9), %s990_s7, 256, %s1000_s9, %s185_s11  }
  0x29   : > { %p1162_p1 = scmp.lt.s32.totalorder %s898_s20, 3  ;;  %p1163_p5 = scmp.ge.s32.totalorder %s898_s20, 1 }
  0x2a   : > { %s1043_s14 = scalar_lea.hbm %s1154_s1, %s718_s29  ;;  %s209_s15 = scalar_lea.vmem [#allocation6], %s699_s30 }
  0x2b   : > { %p1034_p6 = pnand %p1163_p5, %p1162_p1  ;;  %s219_s21 = sshll.u32 %s209_s15, 4  ;;  %s220_s21 = int_to_ptr.vmem [resolvable:$true] %s219_s21 }
  0x2c   : > { %s206_s7 = scalar_lea.sflag [#allocation7], %s981_s28  ;;  %s814_s9 = scalar_lea.hbm %s1043_s14, 256 }
  0x2d   : > { %s1164_s8 = scalar_select %p1034_p6, 1, 0 }
  0x2e   : > { %p815_p10 = scmp.ne.s32.totalorder %s1043_s14, %s814_s9  ;;  %s819_s29 = scalar_lea.hbm %s1154_s1, 512 }
  0x2f   : > { %p820_p12 = scmp.lt.u32.totalorder %s1043_s14, %s1154_s1  ;;  %p821_p0 = scmp.lt.u32.totalorder %s819_s29, %s814_s9 }
  0x30   : > { %p817_p11 = pnand %p815_p10, %p786_p13  ;;  %p823_p3 = scmp.lt.u32.totalorder %s814_s9, %s1043_s14 }
  0x31   : > { %p822_p2 = por %p821_p0, %p820_p12 }
  0x32   : > { %p818_p8 = pneg %p817_p11 }
  0x33   : > { %p824_p4 = por %p823_p3, %p822_p2 }
  0x35   : > { %p825_p1 = pnand %p824_p4, %p818_p8 }
  0x37   : > { %828 = shalt.err (!%p825_p1)
}
  0x38   : > { %s829_s28 = scalar_lea.vmem %s220_s21, 256  ;;  %s901_s30 = smov [#allocation6]  }
  0x39   : > { %p830_p5 = scmp.ne.s32.totalorder %s220_s21, %s829_s28  ;;  %s834_s5 = sshll.u32 %s901_s30, 4  ;;  %s835_s5 = int_to_ptr.vmem [resolvable:$false] %s834_s5 }
  0x3a   : > { %s836_s6 = scalar_lea.vmem %s835_s5, 512  ;;  %p837_p7 = scmp.lt.s32.totalorder %s220_s21, %s835_s5 }
  0x3b   : > { %p832_p10 = pnand %p830_p5, %p786_p13  ;;  %p838_p6 = scmp.lt.s32.totalorder %s836_s6, %s829_s28 }
  0x3d   : > { %p833_p11 = pneg %p832_p10  ;;  %p839_p0 = por %p838_p6, %p837_p7 }
  0x3f   : > { %p840_p12 = pnand %p839_p0, %p833_p11 }
  0x41   : > { %843 = shalt.err (!%p840_p12)
}
  0x42   : > { %732 = dma.hbm_to_vmem [thread:$0]  (!%p996_p9), %s1043_s14, 256, %s220_s21, %s206_s7  }
  0x43   : > { %p1165_p8 = scmp.ne.s32.totalorder %s1164_s8, 0 }
  0x44   : > { %s242_s12 = sand.u32 (!%p1165_p8), 1, %s882_s16   ;;  %p1166_p13 = scmp.ne.s32.totalorder (!%p1165_p8), %s1160_s26, 0 }
  0x45   : > { %240 = sbr.rel (%p1165_p8) target bundleno = 490 (0x1ea), region = 36  ;;  %s706_s13 = sshll.u32 (!%p1165_p8), %s242_s12, 4 }
  0x46   : > { %s243_s15 = scalar_lea.sflag (!%p1165_p8), [#allocation5], %s242_s12  ;;  %s246_s9 = scalar_lea.vmem (!%p1165_p8), [#allocation4], %s706_s13 }
  0x4c   : > { %869 = dma.done.wait (%p1166_p13), %s243_s15, 256  }
  0x4d   : > { %871 = vsyncadd (%p1166_p13), %s243_s15, 4294967040  ;;  %s252_s11 = scalar_lea.sflag [#allocation7], %s242_s12  ;;  %s255_s23 = scalar_lea.vmem [#allocation6], %s706_s13 }
  0x4e   : > { %873 = dma.done.wait (%p1166_p13), %s252_s11, 256  }
  0x4f   : > { %875 = vsyncadd (%p1166_p13), %s252_s11, 4294967040  ;;  %p295_p7 = scmp.lt.s32.totalorder %s890_s18, 1  ;;  %v311_v0 = vlaneseq  ;;  %v902_v1 = vmov 0.0   ;;  %v318_v3 = vld [vmem:[%s255_s23 + $0x8] sm:$0xff]  ;;  %v317_v5 = vld [vmem:[%s255_s23] sm:$0xff]  ;;  %vm325_vm1 = vcmask 64512  }
  0x50   : > { %396 = vmatprep.mubr.f32.mxu0 %v902_v1  ;;  %402 = vmatprep.mubr.f32.mxu1 %v902_v1  ;;  %v320_v4 = vld [vmem:[%s246_s9 + $0x8] sm:$0xff]  ;;  %v319_v7 = vld [vmem:[%s246_s9] sm:$0xff]  ;;  %vm549_vm2 = vcmask 1040384   ;;  %vm576_vm9 = vcmask 1024  }
  0x51   : > { %s1177_s18 = smov (!%p295_p7, %s890_s18), 1  ;;  %vm1082_vm0 = vcmp.lt.s32.totalorder %v311_v0, 256  ;;  %v322_v6 = vsub.f32 %v318_v3, %v320_v4  ;;  %v321_v9 = vsub.f32 %v317_v5, %v319_v7  ;;  %v323_v10 = vld [vmem:[%s1155_s2] sm:$0xff]  ;;  %v324_v11 = vld [vmem:[%s1155_s2 + $0x8] sm:$0xff]  ;;  %v1107_v14 = vshrl.u32 %v311_v0, 7 }
  0x52   : > { %315 = vst.msk [vmem:[#allocation2] sm:$0x3] %vm1082_vm0, %v902_v1  ;;  %316 = vst.msk [vmem:[#allocation3] sm:$0x3] %vm1082_vm0, %v902_v1  ;;  %s708_s26 = sshll.u32 %s1177_s18, 1  ;;  %v411_v23 = vand.u32 127, %v311_v0 }
  0x53   : > { %s301_s14 = scalar_lea.vmem %s1156_s3, %s708_s26  ;;  %332 = vmatprep.subr.mxu0 %v322_v6  ;;  %720 = vmatprep.subr.mxu1 %v322_v6  ;;  %v541_v15 = vsub.s32 0, %v1107_v14  ;;  %v545_v16 = vsub.s32 1, %v1107_v14  ;;  %v418_v30 = vadd.s32 8, %v1107_v14  ;;  %v434_v33 = vand.u32 1, %v1107_v14  ;;  %s306_s30 = scalar_lea.vmem %s1157_s4, %s708_s26 }
  0x54   : > { %v1096_v8 = vld [vmem:[%s301_s14] sm:$0x3]  ;;  %333 = vmatpush1.msra.mxu0 %v321_v9  ;;  %721 = vmatpush1.msra.mxu1 %v321_v9  ;;  %v412_v24 = vadd.s32 128, %v411_v23  ;;  %v419_v25 = vcvt.s32.f32 %v411_v23 }
  0x55   : > { %710 = vmatmul.mubr.msk.f32.vlgmr.msra.gmra.mrb[0].mxu0 %vm325_vm1, %v323_v10  ;;  %711 = vmatmul.mubr.msk.f32.vlgmr.msra.gmra.mrb[0].mxu1 %vm325_vm1, %v324_v11  ;;  %v441_v34 = vand.u32 1, %v418_v30  ;;  %vm454_vm3 = vcmp.eq.s32.totalorder %v434_v33, 0 }
  0x56   : > { %v420_v26 = vcvt.s32.f32 %v412_v24  ;;  %v422_v27 = vmul.f32 0.0625, %v419_v25 }
  0x57   : > { %vm455_vm4 = vcmp.eq.s32.totalorder %v441_v34, 0 }
  0x58   : > { %v423_v28 = vmul.f32 0.0625, %v420_v26  ;;  %v424_v29 = vfloor.f32 %v422_v27 }
  0x59   : > { %v531_v12 = vld [vmem:[#allocation3] sm:$0x3]  ;;  %v505_v34 = vld [vmem:[#allocation2] sm:$0x3] }
  0x5a   : > { %v532_v13 = vadd.f32 %v531_v12, %v1096_v8  ;;  %v425_v31 = vfloor.f32 %v423_v28  ;;  %v426_v32 = vmul.f32 16.0, %v424_v29 }
  0x5c   : > { %533 = vst.msk [vmem:[#allocation3] sm:$0x3] %vm1082_vm0, %v532_v13  ;;  %v427_v35 = vmul.f32 16.0, %v425_v31  ;;  %v428_v36 = vsub.f32 %v419_v25, %v426_v32 }
  0x5e   : > { %v429_v37 = vsub.f32 %v420_v26, %v427_v35  ;;  %v456_v38 = vsel %vm454_vm3, %v428_v36, %v424_v29  ;;  %v458_v39 = vsel %vm455_vm4, %v428_v36, %v424_v29 }
  0x60   : > { %v457_v40 = vsel %vm454_vm3, %v429_v37, %v425_v31  ;;  %v459_v41 = vsel %vm455_vm4, %v429_v37, %v425_v31 }
  0x63   : > { %v555_v17 = vld [vmem:[#allocation3] sm:$0x3] }
  0x64   : > { %v560_v18 = vrot.slane %v555_v17, %v541_v15  ;;  %v564_v19 = vrot.slane %v555_v17, %v545_v16 }
  0x66   : > { %v567_v20 = vsel %vm549_vm2, %v560_v18, 0.0  ;;  %v568_v21 = vsel %vm549_vm2, %v564_v19, 0.0 }
  0x67   : > { %v569_v22 = vadd.f32 %v568_v21, %v567_v20  ;;  %v903_v20 = vmov 1966171168  }
  0x68   : > { %v510_v21 = vunpack.c.l.s4 %v903_v20 }
  0x69   : > { %570 = vadd.xlane.f32.xlu0 %v569_v22 }
  0x6a   : > { %v511_v26 = vunpack.c.0.s8 %v510_v21 }
  0x6c   : > { %v514_v30 = vsub.s32 %v511_v26, %v1107_v14 }
 0x128   : > { %v398_v42 = vpop.f32.mrb[0].mxu0  ;;  %v404_v43 = vpop.f32.mrb[0].mxu1 }
 0x129   : > { %v460_v44 = vsub.f32 %v398_v42, %v456_v38  ;;  %v462_v45 = vsub.f32 %v404_v43, %v458_v39  ;;  %v400_v46 = vpop.f32.mrb[1].mxu0  ;;  %v406_v47 = vpop.f32.mrb[1].mxu1 }
 0x12a   : > { %v461_v48 = vsub.f32 %v400_v46, %v457_v40  ;;  %v463_v49 = vsub.f32 %v406_v47, %v459_v41  ;;  %v571_v43 = vpop.xlane.xlu0 %570 }
 0x12b   : > { %v464_v50 = vand.u32 2147483647, %v460_v44  ;;  %v472_v51 = vmul.f32 0.5, %v460_v44  ;;  %v466_v52 = vand.u32 2147483647, %v462_v45  ;;  %v474_v53 = vmul.f32 0.5, %v462_v45 }
 0x12c   : > { %v465_v54 = vand.u32 2147483647, %v461_v48  ;;  %v473_v55 = vmul.f32 0.5, %v461_v48  ;;  %v467_v56 = vand.u32 2147483647, %v463_v49  ;;  %v475_v57 = vmul.f32 0.5, %v463_v49 }
 0x12d   : > { %vm468_vm5 = vcmp.lt.f32.partialorder %v464_v50, 1.0  ;;  %v476_v58 = vmul.f32 %v472_v51, %v460_v44  ;;  %v712_v59 = vadd.f32 -0.5, %v464_v50  ;;  %vm470_vm6 = vcmp.lt.f32.partialorder %v466_v52, 1.0 }
 0x12e   : > { %v478_v60 = vmul.f32 %v474_v53, %v462_v45  ;;  %v714_v61 = vadd.f32 -0.5, %v466_v52  ;;  %vm469_vm7 = vcmp.lt.f32.partialorder %v465_v54, 1.0  ;;  %v477_v62 = vmul.f32 %v473_v55, %v461_v48 }
 0x12f   : > { %v484_v63 = vsel %vm468_vm5, %v476_v58, %v712_v59  ;;  %v713_v0 = vadd.f32 -0.5, %v465_v54  ;;  %vm471_vm8 = vcmp.lt.f32.partialorder %v467_v56, 1.0  ;;  %v479_v1 = vmul.f32 %v475_v57, %v463_v49 }
 0x130   : > { %v486_v3 = vsel %vm470_vm6, %v478_v60, %v714_v61  ;;  %v715_v4 = vadd.f32 -0.5, %v467_v56  ;;  %v573_v44 = vrot.slane %v571_v43, 7 }
 0x131   : > { %v488_v5 = vadd.f32 %v486_v3, %v484_v63  ;;  %v485_v6 = vsel %vm469_vm7, %v477_v62, %v713_v0 }
 0x132   : > { %v487_v7 = vsel %vm471_vm8, %v479_v1, %v715_v4 }
 0x133   : > { %v489_v9 = vrot.slane %v488_v5, 4  ;;  %v495_v10 = vadd.f32 %v487_v7, %v485_v6 }
 0x135   : > { %v490_v11 = vadd.f32 %v489_v9, %v488_v5  ;;  %v496_v12 = vrot.slane %v495_v10, 4 }
 0x137   : > { %v491_v13 = vrot.slane %v490_v11, 2  ;;  %v497_v17 = vadd.f32 %v496_v12, %v495_v10 }
 0x139   : > { %v492_v18 = vadd.f32 %v491_v13, %v490_v11  ;;  %v498_v19 = vrot.slane %v497_v17, 2 }
 0x13b   : > { %v493_v22 = vrot.slane %v492_v18, 1  ;;  %v499_v23 = vadd.f32 %v498_v19, %v497_v17 }
 0x13d   : > { %v494_v24 = vadd.f32 %v493_v22, %v492_v18  ;;  %v500_v25 = vrot.slane %v499_v23, 1 }
 0x13f   : > { %v502_v27 = vmul.f32 0.0625, %v494_v24  ;;  %v501_v28 = vadd.f32 %v500_v25, %v499_v23 }
 0x141   : > { %v503_v29 = vmul.f32 0.0625, %v501_v28 }
 0x143   : > { %v508_v31 = vcombine.low %v502_v27, %v503_v29 }
 0x145   : > { %v515_v32 = vrot.slane %v508_v31, %v514_v30 }
 0x147   : > { %v522_v33 = vrot.slane %v515_v32, %v514_v30 }
 0x149   : > { %v524_v35 = vmul.f32 %v522_v33, %v1096_v8 }
 0x14b   : > { %v525_v36 = vadd.f32 %v524_v35, %v505_v34 }
 0x14d   : > { %530 = vst.msk [vmem:[#allocation2] sm:$0x3] %vm1082_vm0, %v525_v36 }
 0x154   : > { %v537_v37 = vld [vmem:[#allocation2] sm:$0x3] }
 0x155   : > { %v542_v38 = vrot.slane %v537_v37, %v541_v15  ;;  %v546_v39 = vrot.slane %v537_v37, %v545_v16 }
 0x157   : > { %v550_v40 = vsel %vm549_vm2, %v542_v38, 0.0  ;;  %v551_v41 = vsel %vm549_vm2, %v546_v39, 0.0 }
 0x158   : > { %v552_v42 = vadd.f32 %v551_v41, %v550_v40 }
 0x15a   : > { %553 = vadd.xlane.f32.xlu0 %v552_v42 }
 0x1e7   : > { %v554_v2 = vpop.xlane.xlu0 %553 }
 0x1e8   : > { %v575_v8 = vsel %vm549_vm2, %v554_v2, %v573_v44 }
 0x1e9   : > { %577 = vst.msk [vmem:[%s306_s30] sm:$0x3] %vm576_vm9, %v575_v8 }
 0x1ea PF: > { %s20_s20 = sadd.s32 1, %s898_s20   ;;  %s1169_s15 = smov %s882_s16 }
 0x1eb   : > { %p17_p9 = scmp.ge.s32.totalorder %s20_s20, 4   ;;  %s1170_s16 = smov %s886_s17 }
 0x1ec   : > { %s1171_s17 = smov %s978_s27  ;;  %s1172_s18 = smov %s894_s19 }
 0x1ed   : > { %s1173_s19 = smov %s1175_s22  ;;  %19 = sbr.rel (!%p17_p9) target bundleno = 6 (0x6), region = 100 }
 0x1f4   :  { %597 = vsyncpa [#allocation5], 1 }
 0x1f5   :  { %599 = vsyncpa [#allocation5 + $0x1], 1 }
 0x1f6   :  { %600 = vsyncpa [#allocation7], 1 }
 0x1f7   :  { %602 = vsyncpa [#allocation7 + $0x1], 1 }

</bundles_post_ra>
